<compile_context>
chip_gen: v7x
topology: tpu7x:2x2x1
jax: 0.10.0
libtpu: 0.0.40
codegen_flags: <defaults>
</compile_context>

<pallas_src>
import math

import jax
import jax.numpy as jnp
from jax import lax
from jax.experimental import pallas as pl
from jax.experimental.pallas import tpu as pltpu


def _make_kernel(nb, group, lanes):
    """nb: padded basis count per distance; group: distances per packed row;
    lanes = group * nb (a multiple of 128)."""

    def kernel(d_ref, out_ref):
        # d_ref:   (tm, group)  distances (group consecutive dists per row)
        # out_ref: (tm, lanes)  packed output; lane l = j*nb + k holds
        #                       sin((k+1)*pi * d[:, j]) / d[:, j]
        d = d_ref[...].astype(jnp.float32)                      # (tm, group)
        tm = d.shape[0]

        lane = lax.broadcasted_iota(jnp.int32, (1, lanes), 1)   # (1, lanes)

        if group == 1:
            d_exp = jnp.broadcast_to(d, (tm, lanes))            # lane bcast
            k = lane
        else:
            # Fan-out as ONE MXU matmul against a 0/1 expansion matrix
            # E[j, l] = (l // nb == j), built from iota.  nb is a power of
            # two here, so // nb is a shift and % nb is a mask.
            shift = nb.bit_length() - 1
            lane2 = lax.broadcasted_iota(jnp.int32, (group, lanes), 1)
            row_j = lax.broadcasted_iota(jnp.int32, (group, lanes), 0)
            e = ((lane2 >> shift) == row_j).astype(jnp.float32)  # (G, L)
            # One-hot columns + HIGHEST precision keep d_exp f32-accurate;
            # default (bf16) MXU precision would truncate the distances.
            d_exp = jnp.dot(d, e, preferred_element_type=jnp.float32,
                            precision=lax.Precision.HIGHEST)     # (tm, L)
            k = lane & (nb - 1)

        # Per-lane frequency in closed form: freq = (k + 1) * pi.
        freq = (k + 1).astype(jnp.float32) * math.pi             # (1, lanes)

        # TODO(synk): a Chebyshev sin(k*x) recurrence (1 sin + 1 cos +
        # 1 reciprocal + ~2 FMAs per basis) could reach the HBM roofline on
        # v6e/v7x, but needs a basis-major layout / permutation matmul.
        out = jnp.sin(freq * d_exp) / d_exp
        out_ref[...] = out.astype(out_ref.dtype)

    return kernel


def _default_tile_rows():
    # Bigger tiles on 128 MiB-VMEM parts (v5e/v6e); 4096 on v7x (64 MiB per
    # TensorCore) and as a safe fallback (interpret mode / no TPU info).
    try:
        info = pltpu.get_tpu_info()
        if getattr(info, "vmem_capacity_bytes", 0) >= 96 * 1024 * 1024:
            return 8192
    except Exception:
        pass
    return 4096


def radial_bessel(dist, n_basis=16, *, tile_rows=None, out_dtype=None):
    """DimeNet radial Bessel basis.

    dist: (B, A, A) array of interatomic distances.
    Returns (B, A, A, n_basis) = sin((k+1)*pi*dist) / dist.
    Note: like the PyTorch module, dist == 0 (e.g. the self-distance
    diagonal) yields NaN; feed strictly positive distances or mask it
    downstream.  Pass out_dtype=jnp.bfloat16 to halve output HBM traffic
    (useful near the v5e write roofline) when the consumer tolerates it.
    """
    B, A1, A2 = dist.shape
    N = B * A1 * A2
    out_dtype = dist.dtype if out_dtype is None else jnp.dtype(out_dtype)

    # Pad n_basis up so every output row is a whole number of 128-lane vregs
    # (unmasked full-width stores); extra basis columns are sliced off below.
    if n_basis <= 128:
        nb = 1
        while nb < n_basis:
            nb *= 2                      # next power of two -> divides 128
        group = 128 // nb                # distances packed per output row
    else:
        nb = ((n_basis + 127) // 128) * 128
        group = 1
    lanes = group * nb

    if tile_rows is None:
        tile_rows = _default_tile_rows()

    rows = -(-N // group)
    if rows <= tile_rows:
        # Split into (up to) 2 grid steps so the "parallel" axis can shard
        # across both TensorCores on v7x even for small problems.
        half = -(-rows // 2)
        tm = max(8, ((half + 7) // 8) * 8)
    else:
        tm = tile_rows
    rows_padded = -(-rows // tm) * tm
    grid = (rows_padded // tm,)

    flat = dist.reshape(N)
    pad = rows_padded * group - N
    if pad:
        # Pad with 1.0 (finite, harmless); the tail is sliced off afterwards.
        flat = jnp.concatenate([flat, jnp.ones((pad,), dist.dtype)])
    d2 = flat.reshape(rows_padded, group)

    kernel = _make_kernel(nb, group, lanes)

    in_item = jnp.dtype(dist.dtype).itemsize
    out_item = jnp.dtype(out_dtype).itemsize
    # VMEM footprint: input block pads its last dim to 128 lanes; double
    # buffering plus slack.  Much tighter than a blanket 48 MiB request and
    # comfortably inside v7x's 64 MiB per-TC VMEM.
    per_in = tm * max(group, 128) * in_item
    per_out = tm * lanes * out_item
    vmem_limit = int(min(64 << 20, max(8 << 20, 3 * (per_in + per_out))))

    cost = pl.CostEstimate(
        flops=2 * rows_padded * group * lanes + 3 * rows_padded * lanes,
        transcendentals=2 * rows_padded * lanes,     # sin + divide
        bytes_accessed=in_item * rows_padded * group
        + out_item * rows_padded * lanes,
    )

    # TODO(synk): if profiling on v5e shows the (tm, group) input DMA exposed,
    # feed dist via memory_space=pl.ANY and make_async_copy a lane-dense slab.
    out = pl.pallas_call(
        kernel,
        out_shape=jax.ShapeDtypeStruct((rows_padded, lanes), out_dtype),
        grid_spec=pltpu.PrefetchScalarGridSpec(
            num_scalar_prefetch=0,
            grid=grid,
            in_specs=[pl.BlockSpec((tm, group), lambda i: (i, 0))],
            out_specs=pl.BlockSpec((tm, lanes), lambda i: (i, 0)),
        ),
        compiler_params=pltpu.CompilerParams(
            dimension_semantics=("parallel",),
            vmem_limit_bytes=vmem_limit,
        ),
        cost_estimate=cost,
    )(d2)

    # (rows_padded, group*nb) -> (padded_N, nb) -> slice pad -> (B, A, A, nb)
    out = out.reshape(rows_padded * group, nb)[:N, :n_basis]
    return out.reshape(B, A1, A2, n_basis)


def radial_bessel_reference(dist, frequencies):
    # Pure-JAX reference matching the PyTorch forward.
    return jnp.sin(frequencies * dist[..., None]) / dist[..., None]


if __name__ == "__main__":
    n_basis = 16
    batch, n_atoms = 2, 8

    # Module __init__: frequencies = arange(1, n_basis+1) * pi (non-trainable).
    frequencies = jnp.arange(1, n_basis + 1, dtype=jnp.float32) * jnp.pi

    # Deterministic example input: strictly positive interatomic distances
    # (dist == 0 gives sin(0)/0 = NaN in the PyTorch reference as well).
    key = jax.random.PRNGKey(0)
    dist = jax.random.uniform(
        key, (batch, n_atoms, n_atoms), dtype=jnp.float32,
        minval=0.5, maxval=5.0,
    )

    out = radial_bessel(dist, n_basis=n_basis)
    out = jax.block_until_ready(out)

    ref = radial_bessel_reference(dist, frequencies)
    assert out.shape == (batch, n_atoms, n_atoms, n_basis)
    assert jnp.allclose(out, ref, atol=1e-5, rtol=1e-5)

    print("KERNEL_OK")
</pallas_src>

<mosaic_0001>
module attributes {stable_mosaic.version = 11 : i64} {
  func.func @kernel(%arg0: i32, %arg1: memref<8x8xf32, #tpu.memory_space<vmem>>, %arg2: memref<8x128xf32, #tpu.memory_space<vmem>>) attributes {dimension_semantics = [#tpu.dimension_semantics<parallel>], iteration_bounds = array<i64: 2>, scalar_prefetch = 0 : i64, scratch_operands = 0 : i64, tpu.core_type = #tpu.core_type<tc>, window_params = [{transform_indices = @transform_0, window_bounds = array<i64: 8, 8>}, {transform_indices = @transform_1, window_bounds = array<i64: 8, 128>}]} {
    %c0 = arith.constant 0 : index
    %c0_0 = arith.constant 0 : index
    %0 = vector.load %arg1[%c0, %c0_0] : memref<8x8xf32, #tpu.memory_space<vmem>>, vector<8x8xf32>
    %1 = tpu.iota {dimensions = array<i32: 1>} : vector<1x128xi32>
    %2 = tpu.iota {dimensions = array<i32: 1>} : vector<8x128xi32>
    %3 = tpu.iota {dimensions = array<i32: 0>} : vector<8x128xi32>
    %c4_i32 = arith.constant 4 : i32
    %4 = vector.broadcast %c4_i32 : i32 to vector<8x128xi32>
    %5 = arith.shrsi %2, %4 : vector<8x128xi32>
    %6 = arith.cmpi eq, %5, %3 : vector<8x128xi32>
    %7 = arith.extui %6 : vector<8x128xi1> to vector<8x128xi32>
    %8 = arith.sitofp %7 : vector<8x128xi32> to vector<8x128xf32>
    %cst = arith.constant dense<0.000000e+00> : vector<8x128xf32>
    %9 = tpu.matmul %0, %8, %cst {dimension_numbers = #tpu.dot_dimension_numbers<[1], [0], [0], [1], [0, 0, 1, 1], [], []>, precision = #tpu.contract_precision<fp32>} : vector<8x8xf32>, vector<8x128xf32>, vector<8x128xf32> -> vector<8x128xf32>
    %c15_i32 = arith.constant 15 : i32
    %10 = vector.broadcast %c15_i32 : i32 to vector<1x128xi32>
    %11 = arith.andi %1, %10 : vector<1x128xi32>
    %c1_i32 = arith.constant 1 : i32
    %12 = vector.broadcast %c1_i32 : i32 to vector<1x128xi32>
    %13 = arith.addi %11, %12 : vector<1x128xi32>
    %14 = arith.sitofp %13 : vector<1x128xi32> to vector<1x128xf32>
    %cst_1 = arith.constant 3.14159274 : f32
    %15 = vector.broadcast %cst_1 : f32 to vector<1x128xf32>
    %16 = arith.mulf %14, %15 : vector<1x128xf32>
    %17 = vector.broadcast %16 : vector<1x128xf32> to vector<8x128xf32>
    %18 = arith.mulf %17, %9 : vector<8x128xf32>
    %19 = math.sin %18 : vector<8x128xf32>
    %20 = arith.divf %19, %9 : vector<8x128xf32>
    %c0_2 = arith.constant 0 : index
    %c0_3 = arith.constant 0 : index
    %21 = vector.load %arg2[%c0_2, %c0_3] : memref<8x128xf32, #tpu.memory_space<vmem>>, vector<8x128xf32>
    tpu.vector_store %arg2[%c0_2, %c0_3], %20 {strides = array<i32>} : memref<8x128xf32, #tpu.memory_space<vmem>>, vector<8x128xf32>,
    return
  }
  func.func @transform_0(%arg0: i32) -> (i32, i32) {
    %c0_i32 = arith.constant 0 : i32
    %c0_i32_0 = arith.constant 0 : i32
    return %arg0, %c0_i32 : i32, i32
  }
  func.func @transform_1(%arg0: i32) -> (i32, i32) {
    %c0_i32 = arith.constant 0 : i32
    %c0_i32_0 = arith.constant 0 : i32
    return %arg0, %c0_i32 : i32, i32
  }
}

</mosaic_0001>

<bundles_post_ra>
// kernel: tpu_custom_call.1
= control target key start
LH: loop header
LB: loop body
LE: loop exit
PB: predicated region body
PF: predicated region fallthrough
CT: control target
= control target key end

     0   :  { %6 = vsyncpa [#allocation3], 0  ;;  %s1110_s0 = inlined_call_operand.vmem [shape: f32[16,8], index: 0, kind: input, shape index: {}]   ;;  %s1111_s1 = inlined_call_operand.hbm [shape: f32[16,128], index: 1, kind: output, shape index: {}]  }
   0x1   :  { %8 = vsyncpa [#allocation3 + $0x1], 0  ;;  %s967_s6 = smov 0   ;;  %s969_s7 = smov 0  }
   0x2   :  { %s971_s8 = smov 0   ;;  %s973_s9 = smov 0  }
   0x3 LB: > { %s988_s10 = sadd.s32 4294967295, %s945_s9   ;;  %s756_s11 = sadd.s32 4294967294, %s945_s9   ;;  %s945_s9 = sphi %s973_s9, %s1119_s9   ;;  %s941_s8 = sphi %s971_s8, %s1118_s8   ;;  %s937_s7 = sphi %s969_s7, %s1117_s7   ;;  %s933_s6 = sphi %s967_s6, %s1116_s6  }
   0x4   : > { %s992_s12 = sadd.s32 1, %s945_s9   ;;  %s47_s13 = sadd.s32 1, %s941_s8 }
   0x5   : > { %s44_s14 = ssub.s32 %s945_s9, %s992_s12  ;;  %p57_p0 = scmp.ne.s32.totalorder %s941_s8, %s937_s7 }
   0x6   : > { %p45_p1 = scmp.eq.s32.totalorder %s44_s14, 0  ;;  %p58_p2 = scmp.eq.s32.totalorder %s988_s10, 1 }
   0x7   : > { %p63_p3 = scmp.ne.s32.totalorder %s937_s7, %s933_s6  ;;  %p64_p4 = scmp.eq.s32.totalorder %s756_s11, 1 }
   0x8   : > { %s1003_s15 = scalar_select %p45_p1, %s941_s8, %s47_s13  }
   0x9   : > { %p1005_p5 = por %p58_p2, %p57_p0  ;;  %p1009_p6 = por %p64_p4, %p63_p3 }
   0xa   : > { %p759_p7 = scmp.ge.s32.totalorder %s945_s9, 1  ;;  %p89_p8 = scmp.lt.s32.totalorder %s945_s9, 3 }
   0xc   : > { %p90_p9 = pnand %p759_p7, %p89_p8 }
   0xd   : > { %v113_v0 = vlaneseq (!%p90_p9)  ;;  %p108_p10 = scmp.lt.s32.totalorder (!%p90_p9), %s988_s10, 1  ;;  %v947_v1 = vmov (!%p90_p9), 0.0   ;;  %vm948_vm0 = vmmov (!%p90_p9), 0   ;;  %vm121_vm1 = vcmask (!%p90_p9), 64512   ;;  %s105_s23 = sand.u32 (!%p90_p9), 1, %s937_s7  }
   0xe   : > { %93 = sbr.rel (%p90_p9) target bundleno = 364 (0x16c), region = 24  ;;  %801 = vmatprep.subr.mxu0 (!%p90_p9), %v947_v1  ;;  %803 = vmatprep.mubr.msk.f32.mxu0 (!%p90_p9), %vm948_vm0, %v947_v1  ;;  %v949_v8 = vmov (!%p90_p9), 1.0   ;;  %v950_v39 = vmov (!%p90_p9), 683565275   ;;  %v951_v41 = vmov (!%p90_p9), 2475754826  }
   0xf   : > { %v114_v2 = vand.u32 (!%p90_p9), 127, %v113_v0  ;;  %v116_v3 = vshrl.u32 (!%p90_p9), %v113_v0, 7  ;;  %786 = vmatprep.subr.mxu1 (!%p90_p9), %v947_v1  ;;  %788 = vmatprep.mubr.msk.f32.mxu1 (!%p90_p9), %vm948_vm0, %v947_v1  ;;  %v952_v44 = vmov (!%p90_p9), 2131351028   ;;  %v953_v47 = vmov (!%p90_p9), 2102212464  }
  0x10   : > { %v954_v50 = vmov (!%p90_p9), 920167782   ;;  %v955_v53 = vmov (!%p90_p9), 1326507024   ;;  %s760_s24 = sshll.u32 (!%p90_p9), %s105_s23, 3  ;;  %s771_s25 = sshll.u32 (!%p90_p9), %s988_s10, 7 }
  0x11   : > { %v117_v4 = vshra.s32 (!%p90_p9), %v114_v2, 4  ;;  %v571_v19 = vand.u32 (!%p90_p9), 15, %v114_v2  ;;  %s107_s26 = scalar_lea.vmem (!%p90_p9), [#allocation2], %s760_s24  ;;  %s1068_s30 = scalar_lea.hbm (!%p90_p9), %s1111_s1, %s771_s25 }
  0x12   : > { %s697_s27 = sshll.u32 (!%p90_p9), %s107_s26, 4  ;;  %s684_s2 = scalar_lea.sflag (!%p90_p9), [#allocation3], %s105_s23  ;;  %s1070_s27 = int_to_ptr.vmem [resolvable:$true] %s697_s27 }
  0x13   : > { %vm1022_vm2 = vcmp.eq.s32.totalorder (!%p90_p9), %v117_v4, %v116_v3  ;;  %v572_v20 = vadd.s32 (!%p90_p9), 1, %v571_v19  ;;  %s883_s3 = scalar_lea.vmem (!%p90_p9), %s1070_s27, 128  ;;  %s956_s4 = smov (!%p90_p9), [#allocation2]  }
  0x14   : > { %v762_v7 = vsel (!%p90_p9), %vm1022_vm2, 1.0, %v947_v1  ;;  %802 = vmatpush3.msk.msra.mxu0 (!%p90_p9), %vm1022_vm2, %v949_v8  ;;  %787 = vmatpush3.msk.msra.mxu1 (!%p90_p9), %vm1022_vm2, %v949_v8  ;;  %p884_p11 = scmp.ne.s32.totalorder (!%p90_p9), %s1070_s27, %s883_s3  ;;  %s887_s5 = sshll.u32 (!%p90_p9), %s956_s4, 4  ;;  %s888_s5 = int_to_ptr.vmem [resolvable:$false] %s887_s5 }
  0x15   : > { %s109_s18 = scalar_select %p108_p10, %s988_s10, 1  ;;  %v203_v10 = vsub.f32 %v762_v7, %v762_v7  ;;  %791 = vmatprep.subr.mxu1 %v947_v1  ;;  %806 = vmatprep.subr.mxu0 %v947_v1  ;;  %v573_v21 = vcvt.s32.f32 %v572_v20 }
  0x16   : > { %p885_p12 = pnand %p884_p11, %p1005_p5  ;;  %s889_s10 = scalar_lea.vmem %s888_s5, 256 }
  0x17   : > { %s761_s19 = sshll.u32 %s109_s18, 3  ;;  %v204_v13 = vand.u32 4294901760, %v203_v10  ;;  %v574_v24 = vmul.f32 3.1415927, %v573_v21  ;;  %p890_p0 = scmp.lt.s32.totalorder %s1070_s27, %s888_s5 }
  0x18   : > { %s111_s22 = scalar_lea.vmem %s1110_s0, %s761_s19  ;;  %p886_p13 = pneg %p885_p12 }
  0x19   : > { %v112_v6 = vld [vmem:[%s111_s22] sm:$0xff]  ;;  %v205_v15 = vsub.f32 %v203_v10, %v204_v13  ;;  %p891_p1 = scmp.lt.s32.totalorder %s889_s10, %s883_s3 }
  0x1a   : > { %v123_v9 = vsel %vm121_vm1, %v112_v6, 0 }
  0x1b   : > { %v191_v11 = vand.u32 4294901760, %v123_v9  ;;  %v206_v17 = vand.u32 4294901760, %v205_v15  ;;  %p892_p2 = por %p891_p1, %p890_p0 }
  0x1d   : > { %v192_v12 = vsub.f32 %v123_v9, %v191_v11  ;;  %p893_p3 = pnand %p892_p2, %p886_p13 }
  0x1f   : > { %v193_v14 = vand.u32 4294901760, %v192_v12 }
  0x21   : > { %804 = vmatmul.mubr.f32.vlgmr.msra.gmra.mrb[0].mxu0 %v193_v14  ;;  %v194_v16 = vsub.f32 %v192_v12, %v193_v14 }
  0x22   : > { %807 = vmatpush3.msra.mxu0 %v204_v13  ;;  %808 = vmatprep.mubr.msk.f32.mxu0 %vm948_vm0, %v947_v1 }
  0x23   : > { %v195_v18 = vand.u32 4294901760, %v194_v16  ;;  %811 = vmatprep.subr.mxu0 %v947_v1 }
  0x25   : > { %789 = vmatmul.mubr.f32.vlgmr.msra.gmra.mrb[0].mxu1 %v195_v18 }
  0x26   : > { %792 = vmatpush3.msra.mxu1 %v206_v17  ;;  %793 = vmatprep.mubr.msk.f32.mxu1 %vm948_vm0, %v947_v1 }
  0x27   : > { %796 = vmatprep.subr.mxu1 %v947_v1 }
  0x29   : > { %809 = vmatmul.mubr.f32.vlgmr.msra.gmra.mrb[0].mxu0 %v191_v11 }
  0x2a   : > { %812 = vmatpush3.msk.msra.mxu0 %vm1022_vm2, %v949_v8  ;;  %813 = vmatprep.mubr.msk.f32.mxu0 %vm948_vm0, %v947_v1 }
  0x2d   : > { %794 = vmatmul.mubr.f32.vlgmr.msra.gmra.mrb[0].mxu1 %v191_v11 }
  0x2e   : > { %797 = vmatpush3.msra.mxu1 %v203_v10  ;;  %798 = vmatprep.mubr.msk.f32.mxu1 %vm948_vm0, %v947_v1 }
  0x31   : > { %814 = vmatmul.mubr.f32.vlgmr.msra.gmra.mrb[0].mxu0 %v191_v11 }
  0x35   : > { %799 = vmatmul.mubr.f32.vlgmr.msra.gmra.mrb[0].mxu1 %v192_v12 }
 0x104   : > { %v567_v22 = vpop.f32.mrb[0].mxu0 }
 0x105   : > { %v815_v23 = vpop.f32.mrb[1].mxu0 }
 0x108   : > { %v347_v25 = vpop.f32.mrb[0].mxu1 }
 0x109   : > { %v1038_v26 = vadd.f32 %v567_v22, %v347_v25  ;;  %v800_v27 = vpop.f32.mrb[1].mxu1 }
 0x10b   : > { %v1041_v28 = vmul.f32 %v1038_v26, %v574_v24 }
 0x10d   : > { %v579_v29 = vand.u32 2139095040, %v1041_v28  ;;  %v576_v33 = vand.u32 2147483647, %v1041_v28  ;;  %vm578_vm10 = vcmp.lt.s32.totalorder %v1041_v28, 0  ;;  %vm668_vm15 = vweird.f32 %v1041_v28 }
 0x10f   : > { %v580_v30 = vshrl.u32 %v579_v29, 23  ;;  %v583_v36 = vand.u32 8388607, %v576_v33  ;;  %vm577_vm11 = vcmp.le.f32.partialorder %v576_v33, 0.7853982 }
 0x111   : > { %v766_v31 = vadd.s32 4294967169, %v580_v30  ;;  %v584_v55 = vor.u32 8388608, %v583_v36 }
 0x113   : > { %v586_v32 = vadd.s32 1, %v766_v31  ;;  %v624_v5 = vshll.u32 %v584_v55, 8 }
 0x115   : > { %vm587_vm3 = vcmp.gt.s32.totalorder %v586_v32, 0 }
 0x116   : > { %v588_v34 = vsel %vm587_vm3, %v586_v32, 0 }
 0x117   : > { %v590_v35 = vand.u32 31, %v588_v34  ;;  %v589_v38 = vshrl.u32 %v588_v34, 5 }
 0x119   : > { %v591_v37 = vsub.s32 32, %v590_v35  ;;  %v593_v40 = vshll.u32 %v950_v39, %v590_v35  ;;  %v596_v42 = vshll.u32 %v951_v41, %v590_v35  ;;  %v599_v46 = vshll.u32 %v952_v44, %v590_v35 }
 0x11a   : > { %v602_v49 = vshll.u32 %v953_v47, %v590_v35  ;;  %v605_v52 = vshll.u32 %v954_v50, %v590_v35  ;;  %vm608_vm4 = vcmp.lt.s32.totalorder %v589_v38, 1  ;;  %vm611_vm5 = vcmp.lt.s32.totalorder %v589_v38, 4 }
 0x11b   : > { %v594_v43 = vshrl.u32 %v951_v41, %v591_v37  ;;  %v597_v45 = vshrl.u32 %v952_v44, %v591_v37  ;;  %v600_v48 = vshrl.u32 %v953_v47, %v591_v37  ;;  %v603_v51 = vshrl.u32 %v954_v50, %v591_v37 }
 0x11c   : > { %v606_v54 = vshrl.u32 %v955_v53, %v591_v37  ;;  %v592_v0 = vshrl.u32 %v950_v39, %v591_v37  ;;  %vm610_vm6 = vcmp.lt.s32.totalorder %v589_v38, 3  ;;  %vm609_vm7 = vcmp.lt.s32.totalorder %v589_v38, 2 }
 0x11d   : > { %v595_v56 = vor.u32 %v594_v43, %v593_v40  ;;  %v598_v57 = vor.u32 %v597_v45, %v596_v42  ;;  %v601_v58 = vor.u32 %v600_v48, %v599_v46  ;;  %v604_v59 = vor.u32 %v603_v51, %v602_v49 }
 0x11e   : > { %v607_v60 = vor.u32 %v606_v54, %v605_v52 }
 0x11f   : > { %v613_v61 = vsel %vm611_vm5, %v601_v58, 2102212464  ;;  %v616_v62 = vsel %vm608_vm4, %v595_v56, %v598_v57  ;;  %v620_v63 = vsel %vm608_vm4, %v598_v57, %v601_v58  ;;  %v617_v1 = vsel %vm611_vm5, %v604_v59, 920167782 }
 0x120   : > { %v621_v2 = vsel %vm611_vm5, %v607_v60, 1326507024  ;;  %v618_v3 = vsel %vm610_vm6, %v601_v58, %v617_v1  ;;  %v612_v6 = vsel %vm608_vm4, %v592_v0, %v595_v56  ;;  %v614_v7 = vsel %vm610_vm6, %v598_v57, %v613_v61 }
 0x121   : > { %v622_v4 = vsel %vm610_vm6, %v604_v59, %v621_v2  ;;  %v619_v8 = vsel %vm609_vm7, %v616_v62, %v618_v3  ;;  %v615_v14 = vsel %vm609_vm7, %v612_v6, %v614_v7 }
 0x122   : > { %v623_v9 = vsel %vm609_vm7, %v620_v63, %v622_v4  ;;  %v1050_v12 = vmul.u32.u64.low %v624_v5, %v619_v8  ;;  %v1051_v13 = vmul.u32.u64.high %v624_v5, %v619_v8, %v1050_v12  ;;  %v631_v16 = vmul.u32 %v624_v5, %v615_v14 }
 0x123   : > { %v1047_v10 = vmul.u32.u64.low %v624_v5, %v623_v9  ;;  %v1048_v11 = vmul.u32.u64.high %v624_v5, %v623_v9, %v1047_v10 }
 0x124   : > { %v634_v15 = vadd.s32 1, %v1051_v13 }
 0x125   : > { %vm633_vm8 = vc.u32 %v1048_v11, %v1050_v12  ;;  %v632_v30 = vadd.s32 %v1050_v12, %v1048_v11 }
 0x126   : > { %v635_v17 = vsel %vm633_vm8, %v634_v15, %v1051_v13 }
 0x127   : > { %v636_v18 = vadd.s32 %v635_v17, %v631_v16 }
 0x129   : > { %v637_v19 = vadd.s32 536870912, %v636_v18 }
 0x12b   : > { %v638_v20 = vshrl.u32 %v637_v19, 30 }
 0x12d   : > { %v639_v21 = vshll.u32 %v638_v20, 30  ;;  %v662_v43 = vsub.s32 4, %v638_v20 }
 0x12f   : > { %v640_v22 = vsub.s32 %v636_v18, %v639_v21  ;;  %v663_v46 = vsel %vm578_vm10, %v662_v43, %v638_v20 }
 0x130   : > { %v665_v48 = vsel %vm577_vm11, 0, %v663_v46 }
 0x131   : > { %v642_v23 = vsub.s32 0, %v640_v22  ;;  %v669_v49 = vadd.s32 3, %v665_v48 }
 0x133   : > { %v767_v24 = vmin.u32 %v642_v23, %v640_v22  ;;  %v670_v50 = vand.u32 3, %v669_v49 }
 0x135   : > { %v644_v25 = vclz %v767_v24  ;;  %vm675_vm12 = vcmp.eq.s32.totalorder %v670_v50, 2  ;;  %vm672_vm13 = vcmp.eq.s32.totalorder %v670_v50, 0  ;;  %vm671_vm14 = vcmp.lt.s32.totalorder %v670_v50, 2 }
 0x137   : > { %v768_v27 = vadd.s32 4294967294, %v644_v25 }
 0x139   : > { %vm769_vm9 = vcmp.lt.s32.totalorder %v768_v27, 0 }
 0x13a   : > { %v647_v29 = vsel %vm769_vm9, 0, %v768_v27 }
 0x13b   : > { %v648_v31 = vsub.s32 32, %v647_v29  ;;  %v652_v32 = vsub.s32 4294967266, %v647_v29  ;;  %v649_v34 = vshll.u32 %v640_v22, %v647_v29 }
 0x13d   : > { %v650_v35 = vshrl.u32 %v632_v30, %v648_v31  ;;  %v653_v36 = vadd.s32 127, %v652_v32 }
 0x13f   : > { %v651_v37 = vor.u32 %v650_v35, %v649_v34  ;;  %v654_v38 = vshll.u32 %v653_v36, 23 }
 0x141   : > { %v655_v39 = vor.u32 4788187, %v654_v38  ;;  %v658_v41 = vcvt.s32.f32 %v651_v37 }
 0x143   : > { %v656_v40 = vand.u32 2147483647, %v655_v39 }
 0x145   : > { %v659_v42 = vmul.f32 %v658_v41, %v656_v40 }
 0x147   : > { %v660_v44 = vxor.u32 2147483648, %v659_v42 }
 0x149   : > { %v661_v45 = vsel %vm578_vm10, %v660_v44, %v659_v42 }
 0x14a   : > { %v664_v47 = vsel %vm577_vm11, %v1041_v28, %v661_v45 }
 0x14b   : > { %877 = vcosq.f32 %v664_v47 }
 0x14c   : > { %879 = vsinq.f32 %v664_v47 }
 0x14d   : > { %881 = vrcp.f32 %v1038_v26 }
 0x155   : > { %v878_v51 = vpop.eup %877 }
 0x156   : > { %v880_v52 = vpop.eup %879  ;;  %v676_v53 = vxor.u32 2147483648, %v878_v51 }
 0x157   : > { %v673_v54 = vxor.u32 2147483648, %v880_v52  ;;  %v882_v57 = vpop.eup %881 }
 0x158   : > { %v677_v33 = vsel %vm675_vm12, %v676_v53, %v880_v52 }
 0x159   : > { %v674_v55 = vsel %vm672_vm13, %v878_v51, %v673_v54 }
 0x15a   : > { %v678_v56 = vsel %vm671_vm14, %v674_v55, %v677_v33 }
 0x15b   : > { %v679_v26 = vsel %vm668_vm15, nan, %v678_v56 }
 0x15c   : > { %v681_v58 = vmul.f32 %v882_v57, %v679_v26 }
 0x15e   : > { %682 = vst [vmem:[%s107_s26] sm:$0xff] %v681_v58 }
 0x15f   : > { %896 = shalt.err (!%p893_p3)
}
 0x160   : > { %s897_s11 = scalar_lea.hbm %s1068_s30, 128  ;;  %s901_s18 = scalar_lea.hbm %s1111_s1, 256 }
 0x161   : > { %p898_p4 = scmp.ne.s32.totalorder %s1068_s30, %s897_s11  ;;  %p902_p9 = scmp.lt.u32.totalorder %s1068_s30, %s1111_s1 }
 0x162   : > { %p903_p10 = scmp.lt.u32.totalorder %s901_s18, %s897_s11  ;;  %p905_p12 = scmp.lt.u32.totalorder %s897_s11, %s1068_s30 }
 0x163   : > { %p899_p7 = pnand %p898_p4, %p1005_p5 }
 0x164   : > { %p904_p11 = por %p903_p10, %p902_p9 }
 0x165   : > { %p900_p8 = pneg %p899_p7 }
 0x166   : > { %p906_p13 = por %p905_p12, %p904_p11 }
 0x168   : > { %p907_p0 = pnand %p906_p13, %p900_p8 }
 0x16a   : > { %910 = shalt.err (!%p907_p0)
}
 0x16b   : > { %829 = dma.vmem_to_hbm [thread:$0]  (%p1005_p5), %s1070_s27, 128, %s1068_s30, %s684_s2  }
 0x16c PF: > { %p835_p1 = scmp.ge.s32.totalorder %s945_s9, 2  ;;  %s709_s21 = sand.u32 1, %s933_s6  }
 0x16d   : > { %s710_s22 = scalar_lea.sflag [#allocation3], %s709_s21 }
 0x16e   : > { %p832_p2 = pnand %p835_p1, %p1009_p6 }
 0x170   : > { %928 = dma.done.wait (!%p832_p2), %s710_s22, 128  }
 0x171   : > { %930 = vsyncadd (!%p832_p2), %s710_s22, 4294967168  ;;  %p11_p3 = scmp.ge.s32.totalorder %s992_s12, 4   ;;  %s1116_s6 = smov %s937_s7 }
 0x172   : > { %s1117_s7 = smov %s941_s8  ;;  %s1118_s8 = smov %s1003_s15 }
 0x173   : > { %s1119_s9 = smov %s992_s12  ;;  %13 = sbr.rel (!%p11_p3) target bundleno = 3 (0x3), region = 59 }
 0x17a   :  { %715 = vsyncpa [#allocation3], 1 }
 0x17b   :  { %717 = vsyncpa [#allocation3 + $0x1], 1 }

</bundles_post_ra>
